<compile_context>
chip_gen: v6e
topology: v6e:2x2x1
jax: 0.10.0
libtpu: 0.0.40
codegen_flags: <defaults>
</compile_context>

<pallas_src>
import jax
import jax.numpy as jnp
from jax.experimental import pallas as pl
from jax.experimental.pallas import tpu as pltpu

_LP = 8  # left zero-pad columns in the scratch (8 => sublane-aligned interior stores)


def _poscnn_kernel(top_ref, x_ref, bot_ref, w_ref, b_ref, o_ref, xpad_ref):
    # top_ref : (1, W, C)   row just above this tile (clamped dup at t == 0, masked)
    # x_ref   : (TH, W, C)  the tile's own rows
    # bot_ref : (1, W, C)   row just below this tile (clamped dup at t == nt-1, masked)
    # w_ref   : (3, 3, C)   depthwise conv weights, (kh, kw, C)
    # b_ref   : (1, C)      bias
    # o_ref   : (TH, W, C)  output tile
    # xpad_ref: (TH+2, W+16, C) f32 scratch: zero-padded stencil window.  Image
    #           columns live at [_LP : _LP+W]; rows 0 / TH+1 are the row halos.
    TH, W, C = x_ref.shape
    PW = xpad_ref.shape[1]
    t = pl.program_id(1)
    nt = pl.num_programs(1)
    f32 = jnp.float32

    # ---- Fill the padded window (single cast pass; stores ride the vst slot). ---
    xpad_ref[1:TH + 1, _LP:_LP + W, :] = x_ref[...].astype(f32)
    # Halo rows: select (not multiply-by-mask) so NaN/Inf in the clamped duplicate
    # row cannot propagate into the first/last image rows.
    top = jnp.where(t > 0, top_ref[...].astype(f32), 0.0)
    bot = jnp.where(t < nt - 1, bot_ref[...].astype(f32), 0.0)
    xpad_ref[0:1, _LP:_LP + W, :] = top
    xpad_ref[TH + 1:TH + 2, _LP:_LP + W, :] = bot
    # Column borders are re-zeroed every step (cheap slab stores), so the scratch
    # never carries stale data across megacore grid partitions.
    xpad_ref[:, 0:_LP, :] = jnp.zeros((TH + 2, _LP, C), f32)
    xpad_ref[:, _LP + W:PW, :] = jnp.zeros((TH + 2, PW - _LP - W, C), f32)

    # ---- 9-tap depthwise MAC; f32 accumulator stays in registers. ---------------
    wk = w_ref[...].astype(f32)       # (3, 3, C); per-channel taps broadcast on lanes
    b = b_ref[...].astype(f32)        # (1, C) -> broadcasts over (TH, W, C)

    # Center tap with residual (+1, stride == 1) and bias folded in: no
    # broadcast_to pass, no separate residual add.
    acc = xpad_ref[1:TH + 1, _LP:_LP + W, :] * (wk[1, 1, :] + 1.0) + b
    for kw_idx in range(3):
        col0 = _LP - 1 + kw_idx       # static column offset: _LP-1, _LP, _LP+1
        for kh_idx in range(3):
            if kh_idx == 1 and kw_idx == 1:
                continue              # already accumulated above
            acc = acc + (xpad_ref[kh_idx:kh_idx + TH, col0:col0 + W, :]
                         * wk[kh_idx, kw_idx, :])

    o_ref[...] = acc.astype(o_ref.dtype)


def _tpu_defaults():
    """Generation-aware tiling defaults (block budget, pipeline depth, VMEM cap)."""
    kind = ""
    try:
        dev = jax.devices()[0]
        if dev.platform == "tpu":
            kind = (getattr(dev, "device_kind", "") or "").lower()
    except Exception:
        pass
    if "v7" in kind or "7x" in kind:
        # 2 TensorCores but only 64 MiB VMEM/core: modest blocks, >= 8 (even)
        # parallel steps so both cores get equal work.
        return dict(block_budget_bytes=3 << 20, min_grid_steps=8,
                    prefer_even_steps=True, vmem_cap_bytes=40 << 20)
    if "v6" in kind:
        # 1 TC, 128 MiB physical VMEM: big tiles, few steps; raise the scoped limit.
        return dict(block_budget_bytes=6 << 20, min_grid_steps=4,
                    prefer_even_steps=False, vmem_cap_bytes=96 << 20)
    # v5e / unknown: 1 TC; default scoped limit is only 16 MiB, so keep blocks
    # moderate and set vmem_limit_bytes explicitly from the real footprint.
    return dict(block_budget_bytes=4 << 20, min_grid_steps=4,
                prefer_even_steps=False, vmem_cap_bytes=96 << 20)


def _pick_row_tile(H, W, C, itemsize, batch, *, block_budget_bytes, min_grid_steps,
                   prefer_even_steps=False):
    """Largest divisor of H whose (TH, W, C) block fits the per-block budget,
    shrunk (never below 8 rows) only if the grid would otherwise be too short to
    pipeline well / feed both v7x TensorCores."""
    divisors = [d for d in range(1, H + 1) if H % d == 0]
    fitting = [d for d in divisors if d * W * C * itemsize <= block_budget_bytes] or [1]
    th = max(fitting)
    while th > 8 and batch * (H // th) < min_grid_steps:
        smaller = [d for d in fitting if d < th]
        if not smaller:
            break
        th = max(smaller)
    if prefer_even_steps and (batch * (H // th)) % 2 == 1:
        even = [d for d in fitting if 8 <= d <= th and (batch * (H // d)) % 2 == 0]
        if even:
            th = max(even)
    return th


def pos_cnn_forward(x, weight, bias, H, W, stride=1, row_tile=None):
    """PosCNN forward (stride == 1 path).

    x      : (B, T, C) with T == H * W
    weight : (3, 3, C) depthwise kernel (PyTorch (C,1,3,3): w[c,0,kh,kw] == here[kh,kw,c])
    bias   : (C,)
    returns: (B, T, C)
    """
    if stride != 1:
        # TODO(synk): stride != 1 path (strided depthwise conv, no residual) not implemented.
        raise NotImplementedError("Only stride=1 is supported in this kernel.")
    B, T, C = x.shape
    assert H * W == T, f"H:{H}*W:{W} must equal T:{T}"
    # NOTE: C maps to the 128-lane axis; real embedding dims (128/384/768) are
    # lane-dense.  For tiny C, pad C to a multiple of 128 outside this function.

    itemsize = jnp.dtype(x.dtype).itemsize
    defaults = _tpu_defaults()
    if row_tile is not None:
        TH = row_tile
    else:
        TH = _pick_row_tile(H, W, C, itemsize, B,
                            block_budget_bytes=defaults["block_budget_bytes"],
                            min_grid_steps=defaults["min_grid_steps"],
                            prefer_even_steps=defaults["prefer_even_steps"])
    assert H % TH == 0, f"row_tile {TH} must divide H {H}"
    nt = H // TH

    x_nhwc = x.reshape(B, H, W, C)     # metadata-only reshape, no HBM copy
    bias2 = bias.reshape(1, C)

    # Explicit scoped-VMEM limit: double-buffered in/out blocks + halo rows +
    # the padded f32 scratch + register-spill headroom for the f32 accumulator.
    in_blk = TH * W * C * itemsize
    halo_blk = W * C * itemsize
    out_blk = TH * W * C * itemsize
    xpad_bytes = (TH + 2) * (W + 2 * _LP) * C * 4
    spill_bytes = 2 * TH * W * C * 4
    param_bytes = (9 + 1) * C * 4
    vmem_est = 2 * (in_blk + 2 * halo_blk + out_blk + param_bytes) + xpad_bytes + spill_bytes
    vmem_limit = int(min(defaults["vmem_cap_bytes"], max(32 << 20, int(1.5 * vmem_est))))

    # ~20 flops/elem vs ~2*itemsize bytes/elem: memory-bound on v5e, close to the
    # VALU/HBM crossover on v6e/v7x (hence the in-kernel VPU-op reductions above).
    flops = 20 * B * H * W * C
    bytes_accessed = (2 * B * H * W * C * itemsize            # main read + write
                      + 2 * B * nt * W * C * itemsize         # halo-row re-reads
                      + int(weight.size) * itemsize + int(bias.size) * itemsize)

    out = pl.pallas_call(
        _poscnn_kernel,
        out_shape=jax.ShapeDtypeStruct((B, H, W, C), x.dtype),
        grid_spec=pltpu.PrefetchScalarGridSpec(
            num_scalar_prefetch=0,
            grid=(B, nt),
            in_specs=[
                # Row just above the tile (clamped; replaced by zeros in-kernel at t == 0).
                pl.BlockSpec((None, 1, W, C),
                             lambda b, t: (b, jnp.maximum(t * TH - 1, 0), 0, 0)),
                # The tile itself.
                pl.BlockSpec((None, TH, W, C), lambda b, t: (b, t, 0, 0)),
                # Row just below the tile (clamped; replaced by zeros at t == nt - 1).
                pl.BlockSpec((None, 1, W, C),
                             lambda b, t: (b, jnp.minimum((t + 1) * TH, H - 1), 0, 0)),
                pl.BlockSpec((3, 3, C), lambda b, t: (0, 0, 0)),
                pl.BlockSpec((1, C), lambda b, t: (0, 0)),
            ],
            out_specs=pl.BlockSpec((None, TH, W, C), lambda b, t: (b, t, 0, 0)),
            scratch_shapes=[pltpu.VMEM((TH + 2, W + 2 * _LP, C), jnp.float32)],
        ),
        compiler_params=pltpu.CompilerParams(
            dimension_semantics=("parallel", "parallel"),
            vmem_limit_bytes=vmem_limit,
        ),
        cost_estimate=pl.CostEstimate(
            flops=int(flops), transcendentals=0, bytes_accessed=int(bytes_accessed)),
    )(x_nhwc, x_nhwc, x_nhwc, weight, bias2)

    return out.reshape(B, T, C)


def _reference(x, weight, bias, H, W):
    """Pure-JAX reference: NHWC depthwise 3x3 conv (padding 1) + bias + residual."""
    B, T, C = x.shape
    xn = x.reshape(B, H, W, C)
    w_hwio = weight[:, :, None, :]          # (3, 3, 1, C): I = 1 per group, O = C
    conv = jax.lax.conv_general_dilated(
        xn, w_hwio, window_strides=(1, 1), padding=((1, 1), (1, 1)),
        dimension_numbers=("NHWC", "HWIO", "NHWC"), feature_group_count=C)
    return (conv + bias + xn).reshape(B, T, C)


if __name__ == "__main__":
    # Small but lane-dense shapes: batch=2, H=W=16 (T=256), C=128 channels.
    B, C, H, W = 2, 128, 16, 16
    T = H * W

    key = jax.random.PRNGKey(0)
    kx, kw, kb = jax.random.split(key, 3)
    x = jax.random.normal(kx, (B, T, C), dtype=jnp.float32)
    weight = jax.random.normal(kw, (3, 3, C), dtype=jnp.float32) * 0.1
    bias = jax.random.normal(kb, (C,), dtype=jnp.float32) * 0.1

    ref = _reference(x, weight, bias, H, W)

    # Explicit small row tile (exercises the in-kernel halo handling at TH < H).
    out_tiled = jax.block_until_ready(pos_cnn_forward(x, weight, bias, H, W, row_tile=4))
    # Generation-aware auto-picked row tile.
    out_auto = jax.block_until_ready(pos_cnn_forward(x, weight, bias, H, W))

    assert out_tiled.shape == (B, T, C)
    assert jnp.allclose(out_tiled, ref, atol=1e-4, rtol=1e-4), "row-tiled kernel mismatch"
    assert jnp.allclose(out_auto, ref, atol=1e-4, rtol=1e-4), "auto-tiled kernel mismatch"

    print("KERNEL_OK")
</pallas_src>

<mosaic_0001>
module attributes {stable_mosaic.version = 11 : i64} {
  func.func @_poscnn_kernel(%arg0: i32, %arg1: i32, %arg2: memref<1x1x16x128xf32, #tpu.memory_space<vmem>>, %arg3: memref<1x4x16x128xf32, #tpu.memory_space<vmem>>, %arg4: memref<1x1x16x128xf32, #tpu.memory_space<vmem>>, %arg5: memref<3x3x128xf32, #tpu.memory_space<vmem>>, %arg6: memref<1x128xf32, #tpu.memory_space<vmem>>, %arg7: memref<1x4x16x128xf32, #tpu.memory_space<vmem>>, %arg8: memref<6x32x128xf32, #tpu.memory_space<vmem>>) attributes {dimension_semantics = [#tpu.dimension_semantics<parallel>, #tpu.dimension_semantics<parallel>], iteration_bounds = array<i64: 2, 4>, scalar_prefetch = 0 : i64, scratch_operands = 1 : i64, tpu.core_type = #tpu.core_type<tc>, window_params = [{transform_indices = @transform_0, window_bounds = array<i64: 1, 1, 16, 128>}, {transform_indices = @transform_1, window_bounds = array<i64: 1, 4, 16, 128>}, {transform_indices = @transform_2, window_bounds = array<i64: 1, 1, 16, 128>}, {pipeline_mode = #tpu.pipeline_mode<synchronous>, transform_indices = @transform_3, window_bounds = array<i64: 3, 3, 128>}, {pipeline_mode = #tpu.pipeline_mode<synchronous>, transform_indices = @transform_4, window_bounds = array<i64: 1, 128>}, {transform_indices = @transform_5, window_bounds = array<i64: 1, 4, 16, 128>}]} {
    %c0 = arith.constant 0 : index
    %c0_0 = arith.constant 0 : index
    %c0_1 = arith.constant 0 : index
    %c0_2 = arith.constant 0 : index
    %0 = vector.load %arg3[%c0, %c0_0, %c0_1, %c0_2] : memref<1x4x16x128xf32, #tpu.memory_space<vmem>>, vector<1x4x16x128xf32>
    %1 = vector.shape_cast %0 : vector<1x4x16x128xf32> to vector<4x16x128xf32>
    %c1 = arith.constant 1 : index
    %c8 = arith.constant 8 : index
    %c0_3 = arith.constant 0 : index
    %2 = vector.load %arg8[%c1, %c8, %c0_3] : memref<6x32x128xf32, #tpu.memory_space<vmem>>, vector<4x16x128xf32>
    tpu.vector_store %arg8[%c1, %c8, %c0_3], %1 {strides = array<i32>} : memref<6x32x128xf32, #tpu.memory_space<vmem>>, vector<4x16x128xf32>,
    %c0_i32 = arith.constant 0 : i32
    %3 = arith.cmpi sgt, %arg1, %c0_i32 : i32
    %c0_4 = arith.constant 0 : index
    %c0_5 = arith.constant 0 : index
    %c0_6 = arith.constant 0 : index
    %c0_7 = arith.constant 0 : index
    %4 = vector.load %arg2[%c0_4, %c0_5, %c0_6, %c0_7] : memref<1x1x16x128xf32, #tpu.memory_space<vmem>>, vector<1x1x16x128xf32>
    %5 = vector.shape_cast %4 : vector<1x1x16x128xf32> to vector<1x16x128xf32>
    %cst = arith.constant 0.000000e+00 : f32
    %6 = vector.broadcast %cst : f32 to vector<1x16x128xf32>
    %7 = arith.select %3, %5, %6 : vector<1x16x128xf32>
    %c3_i32 = arith.constant 3 : i32
    %8 = arith.cmpi slt, %arg1, %c3_i32 : i32
    %c0_8 = arith.constant 0 : index
    %c0_9 = arith.constant 0 : index
    %c0_10 = arith.constant 0 : index
    %c0_11 = arith.constant 0 : index
    %9 = vector.load %arg4[%c0_8, %c0_9, %c0_10, %c0_11] : memref<1x1x16x128xf32, #tpu.memory_space<vmem>>, vector<1x1x16x128xf32>
    %10 = vector.shape_cast %9 : vector<1x1x16x128xf32> to vector<1x16x128xf32>
    %cst_12 = arith.constant 0.000000e+00 : f32
    %11 = vector.broadcast %cst_12 : f32 to vector<1x16x128xf32>
    %12 = arith.select %8, %10, %11 : vector<1x16x128xf32>
    %c0_13 = arith.constant 0 : index
    %c8_14 = arith.constant 8 : index
    %c0_15 = arith.constant 0 : index
    %13 = vector.load %arg8[%c0_13, %c8_14, %c0_15] : memref<6x32x128xf32, #tpu.memory_space<vmem>>, vector<1x16x128xf32>
    tpu.vector_store %arg8[%c0_13, %c8_14, %c0_15], %7 {strides = array<i32>} : memref<6x32x128xf32, #tpu.memory_space<vmem>>, vector<1x16x128xf32>,
    %c5 = arith.constant 5 : index
    %c8_16 = arith.constant 8 : index
    %c0_17 = arith.constant 0 : index
    %14 = vector.load %arg8[%c5, %c8_16, %c0_17] : memref<6x32x128xf32, #tpu.memory_space<vmem>>, vector<1x16x128xf32>
    tpu.vector_store %arg8[%c5, %c8_16, %c0_17], %12 {strides = array<i32>} : memref<6x32x128xf32, #tpu.memory_space<vmem>>, vector<1x16x128xf32>,
    %cst_18 = arith.constant 0.000000e+00 : f32
    %15 = vector.broadcast %cst_18 : f32 to vector<6x8x128xf32>
    %c0_19 = arith.constant 0 : index
    %c0_20 = arith.constant 0 : index
    %c0_21 = arith.constant 0 : index
    %16 = vector.load %arg8[%c0_19, %c0_20, %c0_21] : memref<6x32x128xf32, #tpu.memory_space<vmem>>, vector<6x8x128xf32>
    tpu.vector_store %arg8[%c0_19, %c0_20, %c0_21], %15 {strides = array<i32>} : memref<6x32x128xf32, #tpu.memory_space<vmem>>, vector<6x8x128xf32>,
    %cst_22 = arith.constant 0.000000e+00 : f32
    %17 = vector.broadcast %cst_22 : f32 to vector<6x8x128xf32>
    %c0_23 = arith.constant 0 : index
    %c24 = arith.constant 24 : index
    %c0_24 = arith.constant 0 : index
    %18 = vector.load %arg8[%c0_23, %c24, %c0_24] : memref<6x32x128xf32, #tpu.memory_space<vmem>>, vector<6x8x128xf32>
    tpu.vector_store %arg8[%c0_23, %c24, %c0_24], %17 {strides = array<i32>} : memref<6x32x128xf32, #tpu.memory_space<vmem>>, vector<6x8x128xf32>,
    %c0_25 = arith.constant 0 : index
    %c0_26 = arith.constant 0 : index
    %c0_27 = arith.constant 0 : index
    %19 = vector.load %arg5[%c0_25, %c0_26, %c0_27] : memref<3x3x128xf32, #tpu.memory_space<vmem>>, vector<3x3x128xf32>
    %c0_28 = arith.constant 0 : index
    %c0_29 = arith.constant 0 : index
    %20 = vector.load %arg6[%c0_28, %c0_29] : memref<1x128xf32, #tpu.memory_space<vmem>>, vector<1x128xf32>
    %c1_30 = arith.constant 1 : index
    %c8_31 = arith.constant 8 : index
    %c0_32 = arith.constant 0 : index
    %21 = vector.load %arg8[%c1_30, %c8_31, %c0_32] : memref<6x32x128xf32, #tpu.memory_space<vmem>>, vector<4x16x128xf32>
    %22 = vector.extract_strided_slice %19 {offsets = [1, 1, 0], sizes = [1, 1, 128], strides = [1, 1, 1]} : vector<3x3x128xf32> to vector<1x1x128xf32>
    %23 = vector.shape_cast %22 : vector<1x1x128xf32> to vector<128xf32>
    %cst_33 = arith.constant 1.000000e+00 : f32
    %24 = vector.broadcast %cst_33 : f32 to vector<128xf32>
    %25 = arith.addf %23, %24 : vector<128xf32>
    %26 = vector.shape_cast %25 : vector<128xf32> to vector<1x1x128xf32>
    %27 = vector.broadcast %26 : vector<1x1x128xf32> to vector<4x16x128xf32>
    %28 = arith.mulf %21, %27 : vector<4x16x128xf32>
    %29 = vector.shape_cast %20 : vector<1x128xf32> to vector<1x1x128xf32>
    %30 = vector.broadcast %29 : vector<1x1x128xf32> to vector<4x16x128xf32>
    %31 = arith.addf %28, %30 : vector<4x16x128xf32>
    %c0_34 = arith.constant 0 : index
    %c7 = arith.constant 7 : index
    %c0_35 = arith.constant 0 : index
    %32 = vector.load %arg8[%c0_34, %c7, %c0_35] : memref<6x32x128xf32, #tpu.memory_space<vmem>>, vector<4x16x128xf32>
    %33 = vector.extract_strided_slice %19 {offsets = [0, 0, 0], sizes = [1, 1, 128], strides = [1, 1, 1]} : vector<3x3x128xf32> to vector<1x1x128xf32>
    %34 = vector.shape_cast %33 : vector<1x1x128xf32> to vector<128xf32>
    %35 = vector.shape_cast %34 : vector<128xf32> to vector<1x1x128xf32>
    %36 = vector.broadcast %35 : vector<1x1x128xf32> to vector<4x16x128xf32>
    %37 = arith.mulf %32, %36 : vector<4x16x128xf32>
    %38 = arith.addf %31, %37 : vector<4x16x128xf32>
    %c1_36 = arith.constant 1 : index
    %c7_37 = arith.constant 7 : index
    %c0_38 = arith.constant 0 : index
    %39 = vector.load %arg8[%c1_36, %c7_37, %c0_38] : memref<6x32x128xf32, #tpu.memory_space<vmem>>, vector<4x16x128xf32>
    %40 = vector.extract_strided_slice %19 {offsets = [1, 0, 0], sizes = [1, 1, 128], strides = [1, 1, 1]} : vector<3x3x128xf32> to vector<1x1x128xf32>
    %41 = vector.shape_cast %40 : vector<1x1x128xf32> to vector<128xf32>
    %42 = vector.shape_cast %41 : vector<128xf32> to vector<1x1x128xf32>
    %43 = vector.broadcast %42 : vector<1x1x128xf32> to vector<4x16x128xf32>
    %44 = arith.mulf %39, %43 : vector<4x16x128xf32>
    %45 = arith.addf %38, %44 : vector<4x16x128xf32>
    %c2 = arith.constant 2 : index
    %c7_39 = arith.constant 7 : index
    %c0_40 = arith.constant 0 : index
    %46 = vector.load %arg8[%c2, %c7_39, %c0_40] : memref<6x32x128xf32, #tpu.memory_space<vmem>>, vector<4x16x128xf32>
    %47 = vector.extract_strided_slice %19 {offsets = [2, 0, 0], sizes = [1, 1, 128], strides = [1, 1, 1]} : vector<3x3x128xf32> to vector<1x1x128xf32>
    %48 = vector.shape_cast %47 : vector<1x1x128xf32> to vector<128xf32>
    %49 = vector.shape_cast %48 : vector<128xf32> to vector<1x1x128xf32>
    %50 = vector.broadcast %49 : vector<1x1x128xf32> to vector<4x16x128xf32>
    %51 = arith.mulf %46, %50 : vector<4x16x128xf32>
    %52 = arith.addf %45, %51 : vector<4x16x128xf32>
    %c0_41 = arith.constant 0 : index
    %c8_42 = arith.constant 8 : index
    %c0_43 = arith.constant 0 : index
    %53 = vector.load %arg8[%c0_41, %c8_42, %c0_43] : memref<6x32x128xf32, #tpu.memory_space<vmem>>, vector<4x16x128xf32>
    %54 = vector.extract_strided_slice %19 {offsets = [0, 1, 0], sizes = [1, 1, 128], strides = [1, 1, 1]} : vector<3x3x128xf32> to vector<1x1x128xf32>
    %55 = vector.shape_cast %54 : vector<1x1x128xf32> to vector<128xf32>
    %56 = vector.shape_cast %55 : vector<128xf32> to vector<1x1x128xf32>
    %57 = vector.broadcast %56 : vector<1x1x128xf32> to vector<4x16x128xf32>
    %58 = arith.mulf %53, %57 : vector<4x16x128xf32>
    %59 = arith.addf %52, %58 : vector<4x16x128xf32>
    %c2_44 = arith.constant 2 : index
    %c8_45 = arith.constant 8 : index
    %c0_46 = arith.constant 0 : index
    %60 = vector.load %arg8[%c2_44, %c8_45, %c0_46] : memref<6x32x128xf32, #tpu.memory_space<vmem>>, vector<4x16x128xf32>
    %61 = vector.extract_strided_slice %19 {offsets = [2, 1, 0], sizes = [1, 1, 128], strides = [1, 1, 1]} : vector<3x3x128xf32> to vector<1x1x128xf32>
    %62 = vector.shape_cast %61 : vector<1x1x128xf32> to vector<128xf32>
    %63 = vector.shape_cast %62 : vector<128xf32> to vector<1x1x128xf32>
    %64 = vector.broadcast %63 : vector<1x1x128xf32> to vector<4x16x128xf32>
    %65 = arith.mulf %60, %64 : vector<4x16x128xf32>
    %66 = arith.addf %59, %65 : vector<4x16x128xf32>
    %c0_47 = arith.constant 0 : index
    %c9 = arith.constant 9 : index
    %c0_48 = arith.constant 0 : index
    %67 = vector.load %arg8[%c0_47, %c9, %c0_48] : memref<6x32x128xf32, #tpu.memory_space<vmem>>, vector<4x16x128xf32>
    %68 = vector.extract_strided_slice %19 {offsets = [0, 2, 0], sizes = [1, 1, 128], strides = [1, 1, 1]} : vector<3x3x128xf32> to vector<1x1x128xf32>
    %69 = vector.shape_cast %68 : vector<1x1x128xf32> to vector<128xf32>
    %70 = vector.shape_cast %69 : vector<128xf32> to vector<1x1x128xf32>
    %71 = vector.broadcast %70 : vector<1x1x128xf32> to vector<4x16x128xf32>
    %72 = arith.mulf %67, %71 : vector<4x16x128xf32>
    %73 = arith.addf %66, %72 : vector<4x16x128xf32>
    %c1_49 = arith.constant 1 : index
    %c9_50 = arith.constant 9 : index
    %c0_51 = arith.constant 0 : index
    %74 = vector.load %arg8[%c1_49, %c9_50, %c0_51] : memref<6x32x128xf32, #tpu.memory_space<vmem>>, vector<4x16x128xf32>
    %75 = vector.extract_strided_slice %19 {offsets = [1, 2, 0], sizes = [1, 1, 128], strides = [1, 1, 1]} : vector<3x3x128xf32> to vector<1x1x128xf32>
    %76 = vector.shape_cast %75 : vector<1x1x128xf32> to vector<128xf32>
    %77 = vector.shape_cast %76 : vector<128xf32> to vector<1x1x128xf32>
    %78 = vector.broadcast %77 : vector<1x1x128xf32> to vector<4x16x128xf32>
    %79 = arith.mulf %74, %78 : vector<4x16x128xf32>
    %80 = arith.addf %73, %79 : vector<4x16x128xf32>
    %c2_52 = arith.constant 2 : index
    %c9_53 = arith.constant 9 : index
    %c0_54 = arith.constant 0 : index
    %81 = vector.load %arg8[%c2_52, %c9_53, %c0_54] : memref<6x32x128xf32, #tpu.memory_space<vmem>>, vector<4x16x128xf32>
    %82 = vector.extract_strided_slice %19 {offsets = [2, 2, 0], sizes = [1, 1, 128], strides = [1, 1, 1]} : vector<3x3x128xf32> to vector<1x1x128xf32>
    %83 = vector.shape_cast %82 : vector<1x1x128xf32> to vector<128xf32>
    %84 = vector.shape_cast %83 : vector<128xf32> to vector<1x1x128xf32>
    %85 = vector.broadcast %84 : vector<1x1x128xf32> to vector<4x16x128xf32>
    %86 = arith.mulf %81, %85 : vector<4x16x128xf32>
    %87 = arith.addf %80, %86 : vector<4x16x128xf32>
    %c0_55 = arith.constant 0 : index
    %c0_56 = arith.constant 0 : index
    %c0_57 = arith.constant 0 : index
    %c0_58 = arith.constant 0 : index
    %88 = vector.load %arg7[%c0_55, %c0_56, %c0_57, %c0_58] : memref<1x4x16x128xf32, #tpu.memory_space<vmem>>, vector<1x4x16x128xf32>
    %89 = vector.shape_cast %88 : vector<1x4x16x128xf32> to vector<4x16x128xf32>
    %90 = vector.shape_cast %87 : vector<4x16x128xf32> to vector<1x4x16x128xf32>
    tpu.vector_store %arg7[%c0_55, %c0_56, %c0_57, %c0_58], %90 {strides = array<i32>} : memref<1x4x16x128xf32, #tpu.memory_space<vmem>>, vector<1x4x16x128xf32>,
    return
  }
  func.func @transform_0(%arg0: i32, %arg1: i32) -> (i32, i32, i32, i32) {
    %c4_i32 = arith.constant 4 : i32
    %0 = arith.muli %arg1, %c4_i32 : i32
    %c1_i32 = arith.constant 1 : i32
    %1 = arith.subi %0, %c1_i32 : i32
    %c0_i32 = arith.constant 0 : i32
    %2 = arith.maxsi %1, %c0_i32 : i32
    %c0_i32_0 = arith.constant 0 : i32
    %c0_i32_1 = arith.constant 0 : i32
    %c0_i32_2 = arith.constant 0 : i32
    return %arg0, %2, %c0_i32_0, %c0_i32_1 : i32, i32, i32, i32
  }
  func.func @transform_1(%arg0: i32, %arg1: i32) -> (i32, i32, i32, i32) {
    %c0_i32 = arith.constant 0 : i32
    %c0_i32_0 = arith.constant 0 : i32
    %c0_i32_1 = arith.constant 0 : i32
    return %arg0, %arg1, %c0_i32, %c0_i32_0 : i32, i32, i32, i32
  }
  func.func @transform_2(%arg0: i32, %arg1: i32) -> (i32, i32, i32, i32) {
    %c1_i32 = arith.constant 1 : i32
    %0 = arith.addi %arg1, %c1_i32 : i32
    %c4_i32 = arith.constant 4 : i32
    %1 = arith.muli %0, %c4_i32 : i32
    %c15_i32 = arith.constant 15 : i32
    %2 = arith.minsi %1, %c15_i32 : i32
    %c0_i32 = arith.constant 0 : i32
    %c0_i32_0 = arith.constant 0 : i32
    %c0_i32_1 = arith.constant 0 : i32
    return %arg0, %2, %c0_i32, %c0_i32_0 : i32, i32, i32, i32
  }
  func.func @transform_3(%arg0: i32, %arg1: i32) -> (i32, i32, i32) {
    %c0_i32 = arith.constant 0 : i32
    %c0_i32_0 = arith.constant 0 : i32
    %c0_i32_1 = arith.constant 0 : i32
    %c0_i32_2 = arith.constant 0 : i32
    return %c0_i32, %c0_i32_0, %c0_i32_1 : i32, i32, i32
  }
  func.func @transform_4(%arg0: i32, %arg1: i32) -> (i32, i32) {
    %c0_i32 = arith.constant 0 : i32
    %c0_i32_0 = arith.constant 0 : i32
    %c0_i32_1 = arith.constant 0 : i32
    return %c0_i32, %c0_i32_0 : i32, i32
  }
  func.func @transform_5(%arg0: i32, %arg1: i32) -> (i32, i32, i32, i32) {
    %c0_i32 = arith.constant 0 : i32
    %c0_i32_0 = arith.constant 0 : i32
    %c0_i32_1 = arith.constant 0 : i32
    return %arg0, %arg1, %c0_i32, %c0_i32_0 : i32, i32, i32, i32
  }
}

</mosaic_0001>

<bundles_post_ra>
// kernel: tpu_custom_call.1
= control target key start
LH: loop header
LB: loop body
LE: loop exit
PB: predicated region body
PF: predicated region fallthrough
CT: control target
= control target key end

     0   :  { %s2041_s0 = inlined_call_operand.hbm [shape: f32[2,16,16,128], index: 0, kind: input, shape index: {}]   ;;  %s2042_s1 = inlined_call_operand.hbm [shape: f32[2,16,16,128], index: 1, kind: input, shape index: {}]   ;;  %s2043_s2 = inlined_call_operand.hbm [shape: f32[2,16,16,128], index: 2, kind: input, shape index: {}]   ;;  %s2044_s3 = inlined_call_operand.hbm [shape: f32[3,3,128], index: 3, kind: input, shape index: {}]   ;;  %s2045_s4 = inlined_call_operand.vmem [shape: f32[1,128], index: 4, kind: input, shape index: {}]   ;;  %s2046_s5 = inlined_call_operand.hbm [shape: f32[2,16,16,128], index: 5, kind: output, shape index: {}]  }
   0x1   :  { %2070 = sst [smem:[#allocation30_spill]] %s2041_s0 }
   0x2   :  { %2071 = sst [smem:[#allocation31_spill]] %s2042_s1 }
   0x3   :  { %2072 = sst [smem:[#allocation32_spill]] %s2043_s2 }
   0x4   :  { %2073 = sst [smem:[#allocation33_spill]] %s2044_s3 }
   0x5   :  { %2074 = sst [smem:[#allocation34_spill]] %s2045_s4 }
   0x6   :  { %2075 = sst [smem:[#allocation35_spill]] %s2046_s5 }
   0x7   :  { %10 = vsyncpa [#allocation4], 0 }
   0x8   :  { %12 = vsyncpa [#allocation4 + $0x1], 0 }
   0x9   :  { %13 = vsyncpa [#allocation7], 0 }
   0xa   :  { %15 = vsyncpa [#allocation7 + $0x1], 0 }
   0xb   :  { %16 = vsyncpa [#allocation10], 0 }
   0xc   :  { %17 = vsyncpa [#allocation5], 0 }
   0xd   :  { %19 = vsyncpa [#allocation5 + $0x1], 0  ;;  %s1409_s18 = smov 0   ;;  %s1411_s19 = smov 0  }
   0xe   :  { %s1413_s20 = smov 0   ;;  %s1415_s21 = smov 0  }
   0xf   :  { %s1417_s22 = smov 0   ;;  %s1419_s23 = smov 0  }
  0x10   :  { %s1421_s24 = smov 0   ;;  %s1423_s25 = smov 0  }
  0x11   :  { %s1425_s26 = smov 0   ;;  %s1427_s27 = smov 0  }
  0x12   :  { %s1429_s28 = smov 0   ;;  %s1431_s29 = smov 0  }
  0x13   :  { %s1433_s30 = smov 0   ;;  %s1435_s6 = smov 0  }
  0x14 LB: > { %2076 = sst [smem:[#allocation17_spill]] %s1313_s18  ;;  %s885_s7 = sadd.s32 4294967294, %s1365_s6   ;;  %s1365_s6 = sphi %s1435_s6, %s25_s6   ;;  %s1361_s30 = sphi %s1433_s30, %s2137_s30   ;;  %s1357_s29 = sphi %s1431_s29, %s2136_s29   ;;  %s1353_s28 = sphi %s1429_s28, %s2135_s28   ;;  %s1349_s27 = sphi %s1427_s27, %s2134_s27   ;;  %s1345_s26 = sphi %s1425_s26, %s2146_s26   ;;  %s1341_s25 = sphi %s1423_s25, %s2145_s25   ;;  %s1337_s24 = sphi %s1421_s24, %s2144_s24   ;;  %s1333_s23 = sphi %s1419_s23, %s2143_s23   ;;  %s1329_s22 = sphi %s1417_s22, %s2142_s22   ;;  %s1325_s21 = sphi %s1415_s21, %s2132_s21   ;;  %s1321_s20 = sphi %s1413_s20, %s2141_s20   ;;  %s1317_s19 = sphi %s1411_s19, %s2140_s19   ;;  %s1313_s18 = sphi %s1409_s18, %s2139_s18  }
  0x15   : > { %2077 = sst [smem:[#allocation18_spill]] %s1325_s21  ;;  %s34_s8 = sadd.s32 1, %s1357_s29 }
  0x16   : > { %2078 = sst [smem:[#allocation19_spill]] %s1329_s22  ;;  %p35_p0 = scmp.ge.s32.totalorder %s34_s8, 4 }
  0x17   : > { %2079 = sst [smem:[#allocation20_spill]] %s1349_s27  ;;  %s37_s9 = sadd.s32 1, %s1361_s30 }
  0x18   : > { %2080 = sst [smem:[#allocation21_spill]] %s1353_s28  ;;  %p2051_p1 = scmp.eq.s32.totalorder %s1365_s6, 0 }
  0x19   : > { %2081 = sst [smem:[#allocation22_spill]] %s1357_s29  ;;  %s2148_s8 = smov (%p35_p0, %s34_s8), 0 }
  0x1a   : > { %2082 = sst [smem:[#allocation23_spill]] %s1361_s30  ;;  %s2150_s9 = smov (!%p35_p0, %s37_s9), %s1361_s30 }
  0x1b   : > { %2083 = sst [smem:[#allocation24_spill]] %s2148_s8  ;;  %p89_p2 = scmp.ne.s32.totalorder %s1333_s23, %s1329_s22 }
  0x1c   : > { %p95_p3 = scmp.ne.s32.totalorder %s1329_s22, %s1325_s21  ;;  %p205_p4 = scmp.eq.s32.totalorder %s885_s7, 7 }
  0x1d   : > { %p1500_p5 = por %p89_p2, %p2051_p1  ;;  %p2050_p7 = scmp.lt.s32.totalorder %s1365_s6, 8 }
  0x1e   : > { %p1507_p6 = por %p205_p4, %p95_p3  ;;  %s1513_s14 = sshll.u32 %s1361_s30, 5 }
  0x1f   : > { %s268_s15 = sand.u32 1, %s1365_s6   ;;  %s270_s16 = sand.u32 1, %s1333_s23  }
  0x20   : > { %s2085_s13 = scalar_select %p1507_p6, 1, 0 }
  0x21   : > { %s901_s17 = sshll.u32 %s270_s16, 6  ;;  %s929_s7 = sshll.u32 %s1357_s29, 3 }
  0x22   : > { %2086 = sst [smem:[#allocation25_spill]] %s2085_s13  ;;  %s279_s10 = sadd.s32 %s929_s7, %s1513_s14 }
  0x23   : > { %s905_s11 = sshll.u32 %s279_s10, 7  ;;  %s272_s5 = scalar_lea.vmem [#allocation6], %s901_s17 }
  0x24   : > { %s282_s28 = sshll.u32 %s272_s5, 4  ;;  %s2087_s1 = sld [smem:[#allocation31_spill]]  ;;  %s283_s28 = int_to_ptr.vmem [resolvable:$true] %s282_s28 }
  0x25   : > { %p1526_p8 = pnand %p2050_p7, %p1500_p5  ;;  %s1530_s18 = scalar_lea.sflag [#allocation7], %s268_s15 }
  0x26   : > { %s1112_s16 = scalar_lea.vmem %s283_s28, 1024  ;;  %s1367_s5 = smov [#allocation6]  }
  0x27   : > { %p1101_p9 = pneg %p1526_p8  ;;  %p1113_p10 = scmp.ne.s32.totalorder %s283_s28, %s1112_s16 }
  0x28   : > { %s1117_s10 = sshll.u32 %s1367_s5, 4  ;;  %s1118_s10 = int_to_ptr.vmem [resolvable:$false] %s1117_s10 }
  0x29   : > { %p1115_p11 = pnand %p1113_p10, %p1101_p9  ;;  %s1119_s4 = scalar_lea.vmem %s1118_s10, 2048 }
  0x2a   : > { %s281_s2 = scalar_lea.hbm %s2087_s1, %s905_s11  ;;  %p1120_p13 = scmp.lt.s32.totalorder %s283_s28, %s1118_s10 }
  0x2b   : > { %p1116_p12 = pneg %p1115_p11  ;;  %p1121_p0 = scmp.lt.s32.totalorder %s1119_s4, %s1112_s16 }
  0x2d   : > { %p1122_p4 = por %p1121_p0, %p1120_p13 }
  0x2f   : > { %p1123_p5 = pnand %p1122_p4, %p1116_p12 }
  0x31   : > { %1126 = shalt.err (!%p1123_p5)
}
  0x32   : > { %s2053_s27 = smov 128   ;;  %s2055_s11 = smov 8  }
  0x33   : > { %955 = dma.hbm_to_vmem [thread:$0]  (!%p1526_p8), %s281_s2, 1024, %s283_s28, %s1530_s18, %s2053_s27, %s2053_s27, %s2055_s11  }
  0x34   : > { %s1541_s12 = sadd.s32 4294967295, %s1365_s6   ;;  %p892_p9 = scmp.ge.s32.totalorder %s1365_s6, 1 }
  0x35   : > { %p2068_p10 = scmp.eq.s32.totalorder %s1541_s12, 0  ;;  %p199_p11 = scmp.eq.s32.totalorder %s1541_s12, 7 }
  0x36   : > { %p212_p12 = scmp.lt.s32.totalorder %s1365_s6, 9  ;;  %s1370_s28 = smov [#allocation9]  }
  0x37   : > { %p1552_p13 = por %p95_p3, %p2068_p10  ;;  %p1559_p0 = por %p199_p11, %p89_p2 }
  0x38   : > { %p1563_p8 = pnand %p892_p9, %p212_p12  ;;  %s224_s17 = sshll.u32 %s1370_s28, 4  ;;  %s225_s17 = int_to_ptr.vmem [resolvable:$true] %s224_s17 }
  0x39   : > { %s2089_s15 = scalar_select %p1552_p13, 1, 0 }
  0x3a   : > { %s2091_s13 = scalar_select %p1559_p0, 1, 0 }
  0x3b   : > { %2090 = sst [smem:[#allocation26_spill]] %s2089_s15  ;;  %p945_p4 = pneg %p1563_p8 }
  0x3c   : > { %2092 = sst [smem:[#allocation27_spill]] %s2091_s13  ;;  %s1138_s7 = scalar_lea.vmem %s225_s17, 192 }
  0x3d   : > { %p946_p3 = pnand %p945_p4, %p2068_p10  ;;  %p1139_p7 = scmp.ne.s32.totalorder %s225_s17, %s1138_s7 }
  0x3e   : > { %p1146_p11 = scmp.lt.s32.totalorder %s225_s17, %s225_s17  ;;  %p1147_p6 = scmp.lt.s32.totalorder %s1138_s7, %s1138_s7 }
  0x3f   : > { %p1129_p5 = pneg %p946_p3 }
  0x40   : > { %p1148_p0 = por %p1147_p6, %p1146_p11 }
  0x41   : > { %p1141_p1 = pnand %p1139_p7, %p1129_p5 }
  0x43   : > { %p1142_p2 = pneg %p1141_p1 }
  0x45   : > { %p1149_p9 = pnand %p1148_p0, %p1142_p2 }
  0x47   : > { %1152 = shalt.err (!%p1149_p9)
}
  0x48   : > { %s1371_s16 = smov 64   ;;  %s1372_s5 = smov 4  }
  0x49   : > { %s2094_s3 = sld [smem:[#allocation33_spill]]  ;;  %p39_p1 = scmp.ge.s32.totalorder %s2150_s9, 2 }
  0x4a   : > { %s886_s28 = sshll.u32 %s1357_s29, 2  ;;  %s888_s7 = sshll.u32 %s2148_s8, 2 }
  0x4b   : > { %s2152_s9 = smov (%p39_p1, %s2150_s9), 0  ;;  %s887_s27 = sadd.s32 4294967295, %s886_s28 }
  0x4c   : > { %2095 = sst [smem:[#allocation28_spill]] %s2152_s9  ;;  %s889_s11 = sadd.s32 4294967295, %s888_s7 }
  0x4d   : > { %p43_p6 = scmp.gt.s32.totalorder %s887_s27, 0  ;;  %p47_p7 = scmp.gt.s32.totalorder %s889_s11, 0 }
  0x4e   : > { %s1582_s1 = ssub.s32 %s1361_s30, %s2152_s9  ;;  %p61_p12 = scmp.ne.s32.totalorder %s1345_s26, %s1341_s25 }
  0x4f   : > { %948 = dma.hbm_to_vmem [thread:$0]  (!%p946_p3), %s2094_s3, 192, %s225_s17, [#allocation10], %s1371_s16, %s1371_s16, %s1372_s5  }
  0x50   : > { %s54_s17 = sadd.s32 1, %s1345_s26  ;;  %s2154_s27 = smov (!%p43_p6, %s887_s27), 0 }
  0x51   : > { %s2156_s11 = smov (!%p47_p7, %s889_s11), 0  ;;  %p67_p0 = scmp.ne.s32.totalorder %s1341_s25, %s1337_s24 }
  0x52   : > { %s50_s16 = ssub.s32 %s2154_s27, %s2156_s11  ;;  %s2096_s5 = ssub.s32 %s1357_s29, %s2148_s8 }
  0x53   : > { %s79_s10 = sor.u32 %s2096_s5, %s1582_s1  ;;  %s51_s4 = sor.u32 %s50_s16, %s1582_s1 }
  0x54   : > { %p2097_p4 = scmp.eq.s32.totalorder %s1365_s6, 0  ;;  %p52_p5 = scmp.eq.s32.totalorder %s51_s4, 0 }
  0x55   : > { %p1602_p2 = por %p2068_p10, %p67_p0  ;;  %p80_p11 = scmp.eq.s32.totalorder %s79_s10, 0 }
  0x56   : > { %p1596_p3 = por %p2097_p4, %p61_p12  ;;  %s1606_s24 = sadd.s32 4, %s886_s28 }
  0x57   : > { %s1609_s11 = scalar_select %p52_p5, %s1345_s26, %s54_s17  }
  0x58   : > { %s2101_s16 = sadd.s32 1, %s1333_s23  ;;  %s1617_s8 = sadd.s32 4, %s888_s7 }
  0x59   : > { %2100 = sst [smem:[#allocation29_spill]] %s1609_s11  ;;  %s241_s4 = sand.u32 1, %s1345_s26  }
  0x5a   : > { %s1614_s5 = scalar_select %p80_p11, %s1333_s23, %s2101_s16  }
  0x5b   : > { %s895_s30 = sshll.u32 %s241_s4, 4  ;;  %s898_s29 = sshll.u32 %s2154_s27, 1 }
  0x5c   : > { %s255_s21 = sadd.s32 %s1513_s14, %s898_s29  ;;  %s245_s10 = scalar_lea.vmem [#allocation3], %s895_s30 }
  0x5d   : > { %s258_s13 = sshll.u32 %s245_s10, 4  ;;  %s900_s15 = sshll.u32 %s255_s21, 7  ;;  %s259_s13 = int_to_ptr.vmem [resolvable:$true] %s258_s13 }
  0x5e   : > { %s2102_s0 = sld [smem:[#allocation30_spill]]  ;;  %p2103_p6 = scmp.lt.s32.totalorder %s1365_s6, 8 }
  0x5f   : > { %s242_s7 = scalar_lea.sflag [#allocation4], %s241_s4  ;;  %s1166_s27 = scalar_lea.vmem %s259_s13, 256 }
  0x60   : > { %p1629_p7 = pnand %p2103_p6, %p1596_p3  ;;  %p1167_p0 = scmp.ne.s32.totalorder %s259_s13, %s1166_s27 }
  0x61   : > { %s1373_s21 = smov [#allocation3]  }
  0x62   : > { %p1155_p12 = pneg %p1629_p7  ;;  %s1171_s29 = sshll.u32 %s1373_s21, 4  ;;  %s1172_s29 = int_to_ptr.vmem [resolvable:$false] %s1171_s29 }
  0x63   : > { %s1173_s30 = scalar_lea.vmem %s1172_s29, 512  ;;  %p1174_p11 = scmp.lt.s32.totalorder %s259_s13, %s1172_s29 }
  0x64   : > { %s257_s17 = scalar_lea.hbm %s2102_s0, %s900_s15  ;;  %p1169_p4 = pnand %p1167_p0, %p1155_p12 }
  0x65   : > { %p1175_p10 = scmp.lt.s32.totalorder %s1173_s30, %s1166_s27 }
  0x66   : > { %p1170_p5 = pneg %p1169_p4 }
  0x67   : > { %p1176_p1 = por %p1175_p10, %p1174_p11 }
  0x69   : > { %p1177_p9 = pnand %p1176_p1, %p1170_p5 }
  0x6b   : > { %1180 = shalt.err (!%p1177_p9)
}
  0x6c   : > { %s2105_s3 = smov 8   ;;  %s2106_s22 = smov 128  }
  0x6d   : > { %s2107_s15 = sld [smem:[#allocation17_spill]]  ;;  %s118_s4 = sadd.s32 1, %s1321_s20 }
  0x6e   : > { %952 = dma.hbm_to_vmem [thread:$0]  (!%p1629_p7), %s257_s17, 256, %s259_s13, %s242_s7, %s2106_s22, %s2106_s22, %s2105_s3  }
  0x6f   : > { %p2108_p10 = scmp.lt.s32.totalorder %s1606_s24, 15  ;;  %p2109_p3 = scmp.lt.s32.totalorder %s1617_s8, 15 }
  0x70   : > { %p125_p9 = scmp.ne.s32.totalorder %s1321_s20, %s1317_s19  ;;  %s294_s28 = sand.u32 1, %s1321_s20  }
  0x71   : > { %s2158_s24 = smov (!%p2108_p10, %s1606_s24), 15  ;;  %s2160_s8 = smov (!%p2109_p3, %s1617_s8), 15 }
  0x72   : > { %s114_s10 = ssub.s32 %s2158_s24, %s2160_s8  ;;  %p2110_p6 = scmp.eq.s32.totalorder %s1365_s6, 0 }
  0x73   : > { %p131_p1 = scmp.ne.s32.totalorder %s1317_s19, %s2107_s15  ;;  %s115_s16 = sor.u32 %s114_s10, %s1582_s1 }
  0x74   : > { %p127_p12 = por %p125_p9, %p2110_p6  ;;  %p116_p0 = scmp.eq.s32.totalorder %s115_s16, 0 }
  0x75   : > { %p2111_p4 = scmp.eq.s32.totalorder %s1541_s12, 0  ;;  %s906_s13 = sshll.u32 %s294_s28, 4 }
  0x76   : > { %s908_s17 = sshll.u32 %s2158_s24, 1  ;;  %s296_s30 = scalar_lea.vmem [#allocation8], %s906_s13 }
  0x77   : > { %p1657_p5 = por %p131_p1, %p2111_p4  ;;  %s306_s21 = sadd.s32 %s908_s17, %s1513_s14 }
  0x78   : > { %s1662_s7 = scalar_select %p116_p0, %s1321_s20, %s118_s4  }
  0x79   : > { %s2112_s27 = scalar_select %p1657_p5, 1, 0 }
  0x7a   : > { %s910_s29 = sshll.u32 %s306_s21, 7  ;;  %s309_s15 = sshll.u32 %s296_s30, 4  ;;  %s310_s15 = int_to_ptr.vmem [resolvable:$true] %s309_s15 }
  0x7b   : > { %s2113_s11 = sld [smem:[#allocation32_spill]]  ;;  %p2114_p7 = scmp.lt.s32.totalorder %s1365_s6, 8 }
  0x7c   : > { %s1194_s24 = scalar_lea.vmem %s310_s15, 256  ;;  %s1374_s14 = smov [#allocation8]  }
  0x7d   : > { %p1670_p11 = pnand %p2114_p7, %p127_p12  ;;  %p1195_p3 = scmp.ne.s32.totalorder %s310_s15, %s1194_s24 }
  0x7e   : > { %s1199_s4 = sshll.u32 %s1374_s14, 4  ;;  %s1200_s4 = int_to_ptr.vmem [resolvable:$false] %s1199_s4 }
  0x7f   : > { %p1183_p10 = pneg %p1670_p11  ;;  %s1201_s28 = scalar_lea.vmem %s1200_s4, 512 }
  0x80   : > { %p1202_p6 = scmp.lt.s32.totalorder %s310_s15, %s1200_s4  ;;  %p1203_p0 = scmp.lt.s32.totalorder %s1201_s28, %s1194_s24 }
  0x81   : > { %s308_s1 = scalar_lea.hbm %s2113_s11, %s910_s29  ;;  %p1197_p9 = pnand %p1195_p3, %p1183_p10 }
  0x82   : > { %p1204_p4 = por %p1203_p0, %p1202_p6 }
  0x83   : > { %p1198_p1 = pneg %p1197_p9 }
  0x85   : > { %p1205_p5 = pnand %p1204_p4, %p1198_p1 }
  0x87   : > { %1208 = shalt.err (!%p1205_p5)
}
  0x88   : > { %958 = dma.hbm_to_vmem [thread:$0]  (!%p1670_p11), %s308_s1, 256, %s310_s15, %s1530_s18, %s2106_s22, %s2106_s22, %s2105_s3  }
  0x89   : > { %321 = sbr.rel (%p1563_p8) target bundleno = 235 (0xeb), region = 40  ;;  %s323_s0 = sand.u32 (!%p1563_p8), 1, %s1341_s25  }
  0x8a   : > { %s1685_s11 = sshll.u32 (!%p1563_p8), %s323_s0, 4  ;;  %s324_s16 = scalar_lea.sflag (!%p1563_p8), [#allocation4], %s323_s0 }
  0x8b   : > { %s327_s13 = scalar_lea.vmem (!%p1563_p8), [#allocation3], %s1685_s11 }
  0x8e   : > { %1292 = dma.done.wait (%p1602_p2), %s324_s16, 256  }
  0x8f   : > { %1294 = vsyncadd (%p1602_p2), %s324_s16, 4294967040  ;;  %s2116_s17 = sld [smem:[#allocation19_spill]]  ;;  %s332_s3 = sand.u32 1, %s1541_s12  }
  0x90   : > { %s333_s21 = scalar_lea.sflag [#allocation7], %s332_s3 }
  0x95   : > { %s334_s2 = sand.u32 1, %s2116_s17  }
  0x96   : > { %s1696_s22 = sshll.u32 %s334_s2, 6 }
  0x97   : > { %s1699_s29 = scalar_lea.vmem [#allocation6], %s1696_s22 }
  0x98   : > { %1296 = dma.done.wait (%p1552_p13), %s333_s21, 1024  }
  0x99   : > { %1298 = vsyncadd (%p1552_p13), %s333_s21, 4294966272  ;;  %s343_s9 = sand.u32 1, %s1317_s19   ;;  %p2118_p8 = scmp.ne.s32.totalorder %s2112_s27, 0 }
  0x9a   : > { %s1706_s30 = sshll.u32 %s343_s9, 4 }
  0x9b   : > { %s345_s15 = scalar_lea.vmem [#allocation8], %s1706_s30 }
  0x9c   : > { %1300 = dma.done.wait (%p2118_p8), %s333_s21, 256  }
  0x9d   : > { %1302 = vsyncadd (%p2118_p8), %s333_s21, 4294967040  ;;  %p2119_p2 = scmp.eq.s32.totalorder %s1541_s12, 0 }
  0x9f   : > { %1304 = dma.done.wait (%p2119_p2), [#allocation10], 192   ;;  %p2120_p12 = pmov %p2119_p2 }
  0xa0   : > { %s2121_s8 = sld [smem:[#allocation20_spill]]  ;;  %v459_v0 = vlaneseq  ;;  %v1375_v1 = vmov 0.0   ;;  %v396_v3 = vld [vmem:[%s1699_s29] sm:$0xff]  ;;  %v397_v4 = vld [vmem:[%s1699_s29 + $0x8] sm:$0xff]  ;;  %v1724_v5 = vld [vmem:[%s1699_s29 + $0x10] sm:$0xff]  ;;  %s1900_s14 = scalar_lea.vmem [#allocation11], %s1696_s22 }
  0xa1   : > { %1306 = vsyncadd (%p2120_p12), [#allocation10], 4294967104  ;;  %435 = vst [vmem:[#allocation2 + $0x20] sm:$0xff] %v1375_v1  ;;  %v1728_v7 = vld [vmem:[%s1699_s29 + $0x18] sm:$0xff]  ;;  %v1731_v8 = vld [vmem:[%s1699_s29 + $0x20] sm:$0xff]  ;;  %s2122_s24 = sld [smem:[#allocation34_spill]] }
  0xa2   : > { %434 = vst [vmem:[#allocation2] sm:$0xff] %v1375_v1  ;;  %436 = vst [vmem:[#allocation2 + $0x40] sm:$0xff] %v1375_v1  ;;  %v460_v2 = vshrl.u32 %v459_v0, 7  ;;  %v1734_v9 = vld [vmem:[%s1699_s29 + $0x28] sm:$0xff]  ;;  %v1742_v11 = vld [vmem:[%s1699_s29 + $0x30] sm:$0xff]  ;;  %s2123_s4 = sld [smem:[#allocation21_spill]] }
  0xa3   : > { %437 = vst [vmem:[#allocation2 + $0x60] sm:$0xff] %v1375_v1  ;;  %438 = vst [vmem:[#allocation2 + $0x80] sm:$0xff] %v1375_v1  ;;  %v1745_v12 = vld [vmem:[%s1699_s29 + $0x38] sm:$0xff]  ;;  %v446_v17 = vld [vmem:[#allocation9] sm:$0x7]  ;;  %s2124_s16 = sld [smem:[#allocation27_spill]] }
  0xa4   : > { %439 = vst [vmem:[#allocation2 + $0xa0] sm:$0xff] %v1375_v1  ;;  %440 = vst [vmem:[#allocation2 + $0x18] sm:$0xff] %v1375_v1  ;;  %v461_v6 = vsub.s32 1, %v460_v2  ;;  %v495_v10 = vsub.s32 0, %v460_v2  ;;  %v636_v14 = vsub.s32 2, %v460_v2  ;;  %s2125_s21 = sld [smem:[#allocation35_spill]] }
  0xa5   : > { %441 = vst [vmem:[#allocation2 + $0x38] sm:$0xff] %v1375_v1  ;;  %442 = vst [vmem:[#allocation2 + $0x58] sm:$0xff] %v1375_v1  ;;  %v447_v19 = vld [vmem:[#allocation9 + $0x4] sm:$0x7]  ;;  %v448_v20 = vld [vmem:[#allocation9 + $0x8] sm:$0x7] }
  0xa6   : > { %p413_p13 = scmp.gt.s32.totalorder %s2121_s8, 0  ;;  %p421_p5 = scmp.lt.s32.totalorder %s2121_s8, 3  ;;  %443 = vst [vmem:[#allocation2 + $0x78] sm:$0xff] %v1375_v1  ;;  %444 = vst [vmem:[#allocation2 + $0x98] sm:$0xff] %v1375_v1  ;;  %v1762_v21 = vrot.slane %v446_v17, %v461_v6  ;;  %v458_v22 = vadd.f32 1.0, %v447_v19  ;;  %v1765_v23 = vrot.slane %v448_v20, %v461_v6  ;;  %v1767_v24 = vrot.slane %v446_v17, %v495_v10 }
  0xa7   : > { %445 = vst [vmem:[#allocation2 + $0xb8] sm:$0xff] %v1375_v1  ;;  %405 = vst [vmem:[#allocation2 + $0x28] sm:$0xff] %v396_v3  ;;  %v1769_v25 = vrot.slane %v447_v19, %v495_v10  ;;  %v1771_v26 = vrot.slane %v446_v17, %v636_v14  ;;  %v1776_v27 = vld [vmem:[%s2122_s24] ss:$0 sm:$0xff]  ;;  %v1780_v29 = vrot.slane %v448_v20, %v495_v10  ;;  %s932_s28 = sshll.u32 %s2121_s8, 3  ;;  %s1966_s30 = scalar_lea.sflag [#allocation5], %s334_s2 }
  0xa8   : > { %s1088_s12 = scalar_select %p413_p13, 255, 0  ;;  %406 = vst [vmem:[#allocation2 + $0x30] sm:$0xff] %v397_v4  ;;  %407 = vst [vmem:[#allocation2 + $0x48] sm:$0xff] %v1724_v5  ;;  %v1778_v28 = vrot.slane %v458_v22, %v461_v6  ;;  %v1783_v31 = vrot.slane %v447_v19, %v636_v14  ;;  %v1787_v34 = vmul.f32 %v1765_v23, %v1724_v5 }
  0xa9   : > { %s1094_s27 = scalar_select %p421_p5, 255, 0  ;;  %408 = vst [vmem:[#allocation2 + $0x50] sm:$0xff] %v1728_v7  ;;  %409 = vst [vmem:[#allocation2 + $0x68] sm:$0xff] %v1731_v8  ;;  %v1789_v36 = vrot.slane %v448_v20, %v636_v14  ;;  %v1794_v38 = vmul.f32 %v1765_v23, %v1728_v7  ;;  %v1800_v42 = vmul.f32 %v1762_v21, %v396_v3 }
  0xaa   : > { %410 = vst [vmem:[#allocation2 + $0x70] sm:$0xff] %v1734_v9  ;;  %v1089_v13 = vld [vmem:[%s327_s13] sm:%s1088_s12]  ;;  %411 = vst [vmem:[#allocation2 + $0x88] sm:$0xff] %v1742_v11  ;;  %v1092_v15 = vld [vmem:[%s327_s13 + $0x8] sm:%s1088_s12]  ;;  %v463_v39 = vmul.f32 %v1778_v28, %v396_v3  ;;  %v1804_v43 = vmul.f32 %v1765_v23, %v1731_v8  ;;  %v1807_v44 = vmul.f32 %v1762_v21, %v397_v4  ;;  %s921_s0 = sshll.u32 %s2123_s4, 5  ;;  %s735_s13 = sshll.u32 %s1900_s14, 4  ;;  %s1956_s13 = int_to_ptr.vmem [resolvable:$true] %s735_s13 }
  0xab   : > { %412 = vst [vmem:[#allocation2 + $0x90] sm:$0xff] %v1745_v12  ;;  %429 = vst [vmem:[#allocation2 + $0x8] sm:$0xff] %v1089_v13  ;;  %v1755_v16 = vld [vmem:[%s345_s15] sm:%s1094_s27]  ;;  %v1760_v18 = vld [vmem:[%s345_s15 + $0x8] sm:%s1094_s27]  ;;  %v582_v30 = vmul.f32 %v1089_v13, %v1762_v21  ;;  %v583_v37 = vmul.f32 %v1092_v15, %v1762_v21  ;;  %v464_v47 = vmul.f32 %v1778_v28, %v397_v4  ;;  %s732_s11 = sadd.s32 %s932_s28, %s921_s0  ;;  %s2126_s9 = smov %s2125_s21 }
  0xac   : > { %430 = vst [vmem:[#allocation2 + $0x10] sm:$0xff] %v1092_v15  ;;  %432 = vst [vmem:[#allocation2 + $0xa8] sm:$0xff] %v1755_v16  ;;  %v1815_v50 = vmul.f32 %v1765_v23, %v1734_v9  ;;  %v1819_v51 = vmul.f32 %v1762_v21, %v1724_v5  ;;  %v477_v52 = vadd.f32 %v1776_v27, %v463_v39  ;;  %s922_s18 = sshll.u32 %s732_s11, 7  ;;  %s1209_s15 = scalar_lea.vmem %s1956_s13, 1024 }
  0xad   : > { %433 = vst [vmem:[#allocation2 + $0xb0] sm:$0xff] %v1760_v18  ;;  %v478_v60 = vadd.f32 %v1776_v27, %v464_v47  ;;  %v465_v2 = vmul.f32 %v1778_v28, %v1724_v5  ;;  %v466_v5 = vmul.f32 %v1778_v28, %v1728_v7  ;;  %s1961_s29 = scalar_lea.hbm %s2125_s21, %s922_s18  ;;  %p1210_p7 = scmp.ne.s32.totalorder %s1956_s13, %s1209_s15 }
  0xae   : > { %v513_v32 = vld [vmem:[#allocation2 + $0x27] sm:$0xff]  ;;  %p2127_p11 = scmp.ne.s32.totalorder %s2124_s16, 0  ;;  %s1376_s8 = smov [#allocation11]  }
  0xaf   : > { %v542_v33 = vld [vmem:[#allocation2 + $0x47] sm:$0xff]  ;;  %v514_v41 = vld [vmem:[#allocation2 + $0x2f] sm:$0xff]  ;;  %v525_v46 = vmul.f32 %v1769_v25, %v513_v32  ;;  %v499_v3 = vmul.f32 %v513_v32, %v1767_v24  ;;  %v479_v17 = vadd.f32 %v1776_v27, %v465_v2  ;;  %s1213_s12 = sshll.u32 %s1376_s8, 4  ;;  %s1214_s12 = int_to_ptr.vmem [resolvable:$false] %s1213_s12 }
  0xb0   : > { %v654_v35 = vld [vmem:[#allocation2 + $0x29] sm:$0xff]  ;;  %v655_v49 = vld [vmem:[#allocation2 + $0x31] sm:$0xff]  ;;  %v554_v54 = vmul.f32 %v1780_v29, %v542_v33  ;;  %v526_v62 = vmul.f32 %v1769_v25, %v514_v41  ;;  %v527_v19 = vmul.f32 %v542_v33, %v1769_v25  ;;  %v500_v39 = vmul.f32 %v514_v41, %v1767_v24  ;;  %p1211_p10 = pnand %p1210_p7, %p2127_p11  ;;  %s1215_s27 = scalar_lea.vmem %s1214_s12, 2048 }
  0xb1   : > { %v1797_v40 = vld [vmem:[#allocation2 + $0x49] sm:$0xff]  ;;  %v666_v56 = vmul.f32 %v1783_v31, %v654_v35  ;;  %v1825_v58 = vld [vmem:[#allocation2 + $0x51] sm:$0xff]  ;;  %v667_v13 = vmul.f32 %v1783_v31, %v655_v49  ;;  %v507_v47 = vadd.f32 %v499_v3, %v479_v17  ;;  %v467_v41 = vmul.f32 %v1778_v28, %v1731_v8  ;;  %p1216_p9 = scmp.lt.s32.totalorder %s1956_s13, %s1214_s12  ;;  %p1217_p1 = scmp.lt.s32.totalorder %s1215_s27, %s1209_s15 }
  0xb2   : > { %v485_v45 = vld [vmem:[#allocation2 + $0x7] sm:$0xff]  ;;  %v1811_v48 = vld [vmem:[#allocation2 + $0x4f] sm:$0xff]  ;;  %v1829_v59 = vmul.f32 %v1789_v36, %v1797_v40  ;;  %v695_v14 = vmul.f32 %v1789_v36, %v1825_v58  ;;  %p1212_p3 = pneg %p1211_p10 }
  0xb3   : > { %v497_v53 = vmul.f32 %v1767_v24, %v485_v45  ;;  %v626_v55 = vld [vmem:[#allocation2 + $0x9] sm:$0xff]  ;;  %v555_v0 = vmul.f32 %v1780_v29, %v1811_v48  ;;  %v627_v1 = vld [vmem:[#allocation2 + $0x11] sm:$0xff]  ;;  %p1218_p6 = por %p1217_p1, %p1216_p9 }
  0xb4   : > { %v486_v57 = vld [vmem:[#allocation2 + $0xf] sm:$0xff]  ;;  %v1839_v4 = vld [vmem:[#allocation2 + $0x67] sm:$0xff]  ;;  %v638_v6 = vmul.f32 %v1771_v26, %v626_v55  ;;  %v639_v22 = vmul.f32 %v1771_v26, %v627_v1  ;;  %v501_v1 = vmul.f32 %v542_v33, %v1767_v24  ;;  %v641_v33 = vmul.f32 %v655_v49, %v1771_v26 }
  0xb5   : > { %v498_v61 = vmul.f32 %v1767_v24, %v486_v57  ;;  %v505_v63 = vadd.f32 %v497_v53, %v477_v52  ;;  %v556_v32 = vmul.f32 %v1780_v29, %v1839_v4  ;;  %v1853_v52 = vld [vmem:[#allocation2 + $0x69] sm:$0xff]  ;;  %v528_v53 = vmul.f32 %v1811_v48, %v1769_v25  ;;  %p1219_p0 = pnand %p1218_p6, %p1212_p3 }
  0xb6   : > { %v640_v57 = vmul.f32 %v654_v35, %v1771_v26  ;;  %v546_v2 = vld [vmem:[#allocation2 + $0x87] sm:$0xff]  ;;  %v481_v35 = vadd.f32 %v1776_v27, %v467_v41 }
  0xb7   : > { %v506_v10 = vadd.f32 %v498_v61, %v478_v60  ;;  %v533_v15 = vadd.f32 %v525_v46, %v505_v63  ;;  %v480_v46 = vadd.f32 %v1776_v27, %v466_v5  ;;  %v668_v60 = vmul.f32 %v1797_v40, %v1783_v31  ;;  %v1861_v61 = vld [vmem:[#allocation2 + $0x6f] sm:$0xff] }
  0xb9   : > { %v534_v20 = vadd.f32 %v526_v62, %v506_v10  ;;  %v562_v45 = vadd.f32 %v554_v54, %v533_v15  ;;  %v535_v62 = vadd.f32 %v527_v19, %v507_v47  ;;  %v508_v63 = vadd.f32 %v500_v39, %v480_v46 }
  0xba   : > { %v529_v10 = vmul.f32 %v1839_v4, %v1769_v25  ;;  %v669_v46 = vmul.f32 %v1825_v58, %v1783_v31 }
  0xbb   : > { %v563_v55 = vadd.f32 %v555_v0, %v534_v20  ;;  %v590_v54 = vadd.f32 %v582_v30, %v562_v45  ;;  %v696_v0 = vmul.f32 %v1789_v36, %v1853_v52  ;;  %v564_v17 = vadd.f32 %v556_v32, %v535_v62  ;;  %v1880_v32 = vld [vmem:[#allocation2 + $0x71] sm:$0xff] }
  0xbc   : > { %v536_v5 = vadd.f32 %v528_v53, %v508_v63  ;;  %v557_v30 = vmul.f32 %v1780_v29, %v1861_v61  ;;  %v558_v20 = vmul.f32 %v1780_v29, %v546_v2 }
  0xbd   : > { %v591_v3 = vadd.f32 %v583_v37, %v563_v55  ;;  %v618_v15 = vadd.f32 %v1787_v34, %v590_v54  ;;  %v509_v37 = vadd.f32 %v501_v1, %v481_v35  ;;  %v592_v45 = vadd.f32 %v1800_v42, %v564_v17  ;;  %v547_v54 = vld [vmem:[#allocation2 + $0x8f] sm:$0xff] }
  0xbe   : > { %v565_v47 = vadd.f32 %v557_v30, %v536_v5  ;;  %v468_v55 = vmul.f32 %v1778_v28, %v1734_v9  ;;  %v530_v1 = vmul.f32 %v1861_v61, %v1769_v25  ;;  %v587_v5 = vmul.f32 %v1762_v21, %v1728_v7 }
  0xbf   : > { %v619_v19 = vadd.f32 %v1794_v38, %v591_v3  ;;  %v646_v39 = vadd.f32 %v638_v6, %v618_v15  ;;  %v537_v53 = vadd.f32 %v529_v10, %v509_v37  ;;  %v502_v38 = vmul.f32 %v1811_v48, %v1767_v24  ;;  %v548_v37 = vld [vmem:[#allocation2 + $0xa7] sm:$0xff] }
  0xc0   : > { %v620_v41 = vadd.f32 %v1804_v43, %v592_v45  ;;  %v593_v42 = vadd.f32 %v1807_v44, %v565_v47  ;;  %v614_v6 = vmul.f32 %v1765_v23, %v1742_v11  ;;  %v482_v63 = vadd.f32 %v1776_v27, %v468_v55 }
  0xc1   : > { %v647_v34 = vadd.f32 %v639_v22, %v619_v19  ;;  %v674_v49 = vadd.f32 %v666_v56, %v646_v39  ;;  %v566_v62 = vadd.f32 %v558_v20, %v537_v53  ;;  %v697_v43 = vmul.f32 %v1789_v36, %v1880_v32 }
  0xc2   : > { %v648_v48 = vadd.f32 %v640_v57, %v620_v41  ;;  %v621_v56 = vadd.f32 %v1815_v50, %v593_v42  ;;  %v510_v10 = vadd.f32 %v502_v38, %v482_v63  ;;  %v670_v50 = vmul.f32 %v1853_v52, %v1783_v31 }
  0xc3   : > { %v675_v22 = vadd.f32 %v667_v13, %v647_v34  ;;  %v702_v3 = vadd.f32 %v1829_v59, %v674_v49  ;;  %v594_v35 = vadd.f32 %v1819_v51, %v566_v62  ;;  %v559_v13 = vmul.f32 %v1780_v29, %v547_v54  ;;  %v686_v51 = vld [vmem:[#allocation2 + $0x89] sm:$0xff] }
  0xc4   : > { %v676_v15 = vadd.f32 %v668_v60, %v648_v48  ;;  %v649_v17 = vadd.f32 %v641_v33, %v621_v56  ;;  %v642_v59 = vmul.f32 %v1797_v40, %v1771_v26  ;;  %v538_v57 = vadd.f32 %v530_v1, %v510_v10 }
  0xc5   : > { %v703_v44 = vadd.f32 %v695_v14, %v675_v22  ;;  %710 = vst [vmem:[%s1900_s14] sm:$0xff] %v702_v3  ;;  %v622_v14 = vadd.f32 %v614_v6, %v594_v35  ;;  %v469_v30 = vmul.f32 %v1778_v28, %v1742_v11  ;;  %v615_v40 = vmul.f32 %v1765_v23, %v1745_v12  ;;  %v549_v6 = vld [vmem:[#allocation2 + $0xaf] sm:$0xff] }
  0xc6   : > { %v704_v19 = vadd.f32 %v696_v0, %v676_v15  ;;  %v677_v60 = vadd.f32 %v669_v46, %v649_v17  ;;  %v503_v33 = vmul.f32 %v1839_v4, %v1767_v24  ;;  %v567_v39 = vadd.f32 %v559_v13, %v538_v57  ;;  %v687_v22 = vld [vmem:[#allocation2 + $0x91] sm:$0xff] }
  0xc7   : > { %711 = vst [vmem:[%s1900_s14 + $0x8] sm:$0xff] %v703_v44  ;;  %v650_v20 = vadd.f32 %v642_v59, %v622_v14  ;;  %v483_v45 = vadd.f32 %v1776_v27, %v469_v30  ;;  %v531_v47 = vmul.f32 %v546_v2, %v1769_v25  ;;  %v698_v11 = vmul.f32 %v1789_v36, %v686_v51  ;;  %v688_v44 = vld [vmem:[#allocation2 + $0xa9] sm:$0xff] }
  0xc8   : > { %712 = vst [vmem:[%s1900_s14 + $0x10] sm:$0xff] %v704_v19  ;;  %v705_v7 = vadd.f32 %v697_v43, %v677_v60  ;;  %v595_v46 = vadd.f32 %v587_v5, %v567_v39  ;;  %v560_v53 = vmul.f32 %v1780_v29, %v548_v37  ;;  %v643_v4 = vmul.f32 %v1825_v58, %v1771_v26 }
  0xc9   : > { %v678_v0 = vadd.f32 %v670_v50, %v650_v20  ;;  %v511_v34 = vadd.f32 %v503_v33, %v483_v45  ;;  %v470_v55 = vmul.f32 %v1778_v28, %v1745_v12  ;;  %v504_v2 = vmul.f32 %v1861_v61, %v1767_v24 }
  0xca   : > { %713 = vst [vmem:[%s1900_s14 + $0x18] sm:$0xff] %v705_v7  ;;  %v623_v49 = vadd.f32 %v615_v40, %v595_v46  ;;  %v588_v42 = vmul.f32 %v1762_v21, %v1731_v8  ;;  %v532_v63 = vmul.f32 %v547_v54, %v1769_v25  ;;  %v671_v12 = vmul.f32 %v1880_v32, %v1783_v31 }
  0xcb   : > { %v706_v38 = vadd.f32 %v698_v11, %v678_v0  ;;  %v539_v41 = vadd.f32 %v531_v47, %v511_v34  ;;  %v484_v62 = vadd.f32 %v1776_v27, %v470_v55  ;;  %v616_v24 = vmul.f32 %v1755_v16, %v1765_v23 }
  0xcc   : > { %v651_v58 = vadd.f32 %v643_v4, %v623_v49  ;;  %v561_v8 = vmul.f32 %v1780_v29, %v549_v6  ;;  %v699_v27 = vmul.f32 %v1789_v36, %v687_v22  ;;  %v589_v54 = vmul.f32 %v1762_v21, %v1734_v9 }
  0xcd   : > { %714 = vst [vmem:[%s1900_s14 + $0x20] sm:$0xff] %v706_v38  ;;  %v568_v28 = vadd.f32 %v560_v53, %v539_v41  ;;  %v512_v61 = vadd.f32 %v504_v2, %v484_v62  ;;  %v644_v43 = vmul.f32 %v1853_v52, %v1771_v26  ;;  %v617_v29 = vmul.f32 %v1760_v18, %v1765_v23  ;;  %v689_v18 = vld [vmem:[#allocation2 + $0xb1] sm:$0xff] }
  0xce   : > { %v679_v1 = vadd.f32 %v671_v12, %v651_v58  ;;  %v672_v10 = vmul.f32 %v686_v51, %v1783_v31  ;;  %v700_v21 = vmul.f32 %v1789_v36, %v688_v44  ;;  %v645_v52 = vmul.f32 %v1880_v32, %v1771_v26 }
  0xcf   : > { %v596_v3 = vadd.f32 %v588_v42, %v568_v28  ;;  %v540_v25 = vadd.f32 %v532_v63, %v512_v61  ;;  %v673_v59 = vmul.f32 %v687_v22, %v1783_v31  ;;  %v701_v14 = vmul.f32 %v1789_v36, %v689_v18 }
  0xd0   : > { %v707_v48 = vadd.f32 %v699_v27, %v679_v1 }
  0xd1   : > { %v624_v56 = vadd.f32 %v616_v24, %v596_v3  ;;  %v569_v16 = vadd.f32 %v561_v8, %v540_v25 }
  0xd2   : > { %715 = vst [vmem:[%s1900_s14 + $0x28] sm:$0xff] %v707_v48 }
  0xd3   : > { %v652_v35 = vadd.f32 %v644_v43, %v624_v56  ;;  %v597_v13 = vadd.f32 %v589_v54, %v569_v16 }
  0xd5   : > { %v680_v9 = vadd.f32 %v672_v10, %v652_v35  ;;  %v625_v15 = vadd.f32 %v617_v29, %v597_v13 }
  0xd7   : > { %v708_v17 = vadd.f32 %v700_v21, %v680_v9  ;;  %v653_v23 = vadd.f32 %v645_v52, %v625_v15 }
  0xd9   : > { %716 = vst [vmem:[%s1900_s14 + $0x30] sm:$0xff] %v708_v17  ;;  %v681_v50 = vadd.f32 %v673_v59, %v653_v23 }
  0xdb   : > { %v709_v51 = vadd.f32 %v701_v14, %v681_v50 }
  0xdd   : > { %717 = vst [vmem:[%s1900_s14 + $0x38] sm:$0xff] %v709_v51 }
  0xde   : > { %1222 = shalt.err (!%p1219_p0)
}
  0xdf   : > { %s1223_s17 = scalar_lea.hbm %s1961_s29, 1024  ;;  %s1227_s10 = scalar_lea.hbm %s2126_s9, 8192 }
  0xe0   : > { %p1224_p4 = scmp.ne.s32.totalorder %s1961_s29, %s1223_s17  ;;  %p1228_p12 = scmp.lt.s32.totalorder %s1961_s29, %s2126_s9 }
  0xe1   : > { %p1229_p13 = scmp.lt.s32.totalorder %s1227_s10, %s1223_s17 }
  0xe2   : > { %p1225_p8 = pnand %p1224_p4, %p2127_p11 }
  0xe3   : > { %p1230_p5 = por %p1229_p13, %p1228_p12 }
  0xe4   : > { %p1226_p2 = pneg %p1225_p8 }
  0xe6   : > { %p1231_p7 = pnand %p1230_p5, %p1226_p2 }
  0xe8   : > { %1234 = shalt.err (!%p1231_p7)
}
  0xe9   : > { %s1377_s4 = smov 128   ;;  %s1378_s28 = smov 8  }
  0xea   : > { %943 = dma.vmem_to_hbm [thread:$0]  (%p2127_p11), %s1956_s13, 1024, %s1961_s29, %s1966_s30, %s1377_s4, %s1377_s4, %s1378_s28  }
  0xeb PF: > { %s2128_s0 = sld [smem:[#allocation18_spill]]  ;;  %p966_p10 = scmp.ge.s32.totalorder %s1365_s6, 2 }
  0xec   : > { %s2129_s11 = sld [smem:[#allocation25_spill]] }
  0xf1   : > { %s750_s18 = sand.u32 1, %s2128_s0  }
  0xf2   : > { %p2130_p3 = scmp.ne.s32.totalorder %s2129_s11, 0  ;;  %s751_s3 = scalar_lea.sflag [#allocation5], %s750_s18 }
  0xf4   : > { %p960_p9 = pnand %p966_p10, %p2130_p3 }
  0xf6   : > { %p961_p1 = pneg %p960_p9 }
  0xf8   : > { %1308 = dma.done.wait (%p961_p1), %s751_s3, 1024  }
  0xf9   : > { %1310 = vsyncadd (%p961_p1), %s751_s3, 4294966272  ;;  %s25_s6 = sadd.s32 1, %s1365_s6   ;;  %s2132_s21 = sld [smem:[#allocation19_spill]] }
  0xfa   : > { %p1994_p6 = scmp.ge.s32.totalorder %s25_s6, 10   ;;  %s2133_s16 = sld [smem:[#allocation29_spill]] }
  0xfb   : > { %s2134_s27 = sld [smem:[#allocation22_spill]]  ;;  %s2139_s18 = smov %s1317_s19 }
  0xfc   : > { %s2135_s28 = sld [smem:[#allocation23_spill]]  ;;  %s2140_s19 = smov %s1321_s20 }
  0xfd   : > { %s2136_s29 = sld [smem:[#allocation24_spill]]  ;;  %s2141_s20 = smov %s1662_s7 }
  0xfe   : > { %s2137_s30 = sld [smem:[#allocation28_spill]]  ;;  %s2142_s22 = smov %s1333_s23 }
  0xff   : > { %s2143_s23 = smov %s1614_s5  ;;  %s2144_s24 = smov %s1341_s25 }
 0x100   : > { %s2145_s25 = smov %s1345_s26  ;;  %s2146_s26 = smov %s2133_s16 }
 0x101   :  { %24 = sbr.rel (!%p1994_p6) target bundleno = 20 (0x14), region = 116 }
 0x106   :  { %756 = vsyncpa [#allocation4], 1 }
 0x107   :  { %758 = vsyncpa [#allocation4 + $0x1], 1 }
 0x108   :  { %759 = vsyncpa [#allocation7], 1 }
 0x109   :  { %761 = vsyncpa [#allocation7 + $0x1], 1 }
 0x10a   :  { %762 = vsyncpa [#allocation10], 1 }
 0x10b   :  { %763 = vsyncpa [#allocation5], 1 }
 0x10c   :  { %765 = vsyncpa [#allocation5 + $0x1], 1 }

</bundles_post_ra>
